<compile_context>
chip_gen: v7x
topology: tpu7x:2x2x1
jax: 0.10.0
libtpu: 0.0.40
codegen_flags: <defaults>
</compile_context>

<pallas_src>
import functools

import jax
import jax.numpy as jnp
from jax.experimental import pallas as pl
from jax.experimental.pallas import tpu as pltpu

IN_F = 10       # fc1 in_features
HID = 50        # fc1 out_features / fc2 in_features
HID_PAD = 128   # hidden padded to one full vreg lane width


def mlp_kernel(x_ref, w1_ref, b1_ref, w2_ref, b2_ref, o_ref):
    # x_ref:  (TB, 10)    current batch tile (streamed / double-buffered)
    # w1_ref: (10, 128)   fc1 weight, hidden zero-padded 50 -> 128 (resident)
    # b1_ref: (1, 128)    fc1 bias, zero-padded (resident)
    # w2_ref: (1, 128)    fc2 weight row, zero-padded (resident)
    # b2_ref: (1, 1)      fc2 bias (resident)
    # o_ref:  (1, TB)     lane-dense output tile (batch on the lane axis)
    x = x_ref[...]
    h = jnp.dot(x, w1_ref[...], preferred_element_type=jnp.float32)   # MXU: (TB, 128)
    h = jnp.maximum(h + b1_ref[...], 0.0)                             # VPU: bias + ReLU (f32)
    # fc2: elementwise multiply (VPU) + cross-lane sum (XLU) — avoids a 1-column MXU
    # matmul.  The subsequent (1, TB) store implies a sublane->lane relayout; XLU has
    # its own VLIW slot and is expected to stay off the critical path at TB<=16K.
    y = jnp.sum(h * w2_ref[...], axis=-1)                             # (TB,)
    o_ref[...] = (y[None, :] + b2_ref[...]).astype(o_ref.dtype)       # (1, TB) full-lane store


def _round_up(n, m):
    return ((n + m - 1) // m) * m


@functools.partial(jax.jit, static_argnames=("block_b",))
def simple_model_forward(x, w1p, b1p, w2p, b2p, *, block_b=8192):
    """x: (B, 10) f32; padded params from pad_params(). Returns (B, 1) f32.

    VMEM budget (why block_b=8192 / vmem_limit=32 MiB):
      per batch row ~1.5 KB = 2 double-buffered x rows lane-padded to 128 lanes
      (2 * 512 B) + the (TB,128) f32 hidden intermediate (512 B); TB=8192 -> ~13 MiB,
      comfortably inside the explicit 32 MiB scoped VMEM on v5e/v6e/v7x.
    """
    B = x.shape[0]
    # Pad batch only to a multiple of 128 (lane-dense output blocks) — NOT to a
    # multiple of the tile; the ragged trailing grid block is handled by Pallas and
    # its extra rows are discarded by the [:B] slice below.
    b128 = _round_up(B, 128)
    if b128 != B:
        x = jnp.pad(x, ((0, b128 - B), (0, 0)))
    tb = min(block_b, b128)            # multiple of 128 in both branches
    grid = pl.cdiv(b128, tb)

    out = pl.pallas_call(
        mlp_kernel,
        out_shape=jax.ShapeDtypeStruct((1, b128), jnp.float32),
        grid=(grid,),
        in_specs=[
            pl.BlockSpec((tb, IN_F), lambda i: (i, 0)),        # x: streamed per batch tile
            pl.BlockSpec((IN_F, HID_PAD), lambda i: (0, 0)),   # w1: same block -> stays resident
            pl.BlockSpec((1, HID_PAD), lambda i: (0, 0)),      # b1
            pl.BlockSpec((1, HID_PAD), lambda i: (0, 0)),      # w2 row
            pl.BlockSpec((1, 1), lambda i: (0, 0)),            # b2
        ],
        out_specs=pl.BlockSpec((1, tb), lambda i: (0, i)),     # lane-dense output tile
        compiler_params=pltpu.CompilerParams(
            dimension_semantics=("parallel",),                 # shard batch across TCs (v7x)
            vmem_limit_bytes=32 << 20,                         # covers v5e's 16 MiB default
        ),
    )(x, w1p, b1p, w2p, b2p)

    # Wrapper-side layout plumbing: (1, B_pad) lane-dense slab -> (B, 1).
    return out.reshape(-1, 1)[:B]


def init_params(key):
    """nn.Linear default init U(-1/sqrt(fan_in), +1/sqrt(fan_in)); weights stored as
    (in_features, out_features), i.e. transpose of the PyTorch layout."""
    k1, k2, k3, k4 = jax.random.split(key, 4)
    bound1 = 1.0 / jnp.sqrt(float(IN_F))
    bound2 = 1.0 / jnp.sqrt(float(HID))
    w1 = jax.random.uniform(k1, (IN_F, HID), jnp.float32, -bound1, bound1)
    b1 = jax.random.uniform(k2, (HID,), jnp.float32, -bound1, bound1)
    w2 = jax.random.uniform(k3, (HID, 1), jnp.float32, -bound2, bound2)
    b2 = jax.random.uniform(k4, (1,), jnp.float32, -bound2, bound2)
    return w1, b1, w2, b2


def pad_params(w1, b1, w2, b2):
    """One-time layout prep (not per call): zero-pad hidden 50 -> 128.
    Padded hidden units contribute 0 (zero w1 cols, zero b1, ReLU(0)=0, zero w2)."""
    w1p = jnp.pad(w1, ((0, 0), (0, HID_PAD - HID)))
    b1p = jnp.pad(b1.reshape(1, HID), ((0, 0), (0, HID_PAD - HID)))
    w2p = jnp.pad(w2.reshape(1, HID), ((0, 0), (0, HID_PAD - HID)))
    b2p = b2.reshape(1, 1)
    return w1p, b1p, w2p, b2p


def _reference(x, w1, b1, w2, b2):
    return jnp.maximum(x @ w1 + b1[None, :], 0.0) @ w2 + b2[None, :]


if __name__ == "__main__":
    key = jax.random.PRNGKey(0)
    kx, kp = jax.random.split(key)
    w1, b1, w2, b2 = init_params(kp)
    params = pad_params(w1, b1, w2, b2)

    # Small-shape check (batch=8) — single grid step.
    batch = 8
    x = jax.random.normal(kx, (batch, IN_F), jnp.float32)
    out = jax.block_until_ready(simple_model_forward(x, *params))
    ref = _reference(x, w1, b1, w2, b2)
    assert out.shape == (batch, 1), out.shape
    assert jnp.allclose(out, ref, atol=1e-5, rtol=1e-5)

    # Multi-step grid + ragged-batch check (batch=300, tile=128 -> grid=3, pad 300->384).
    batch2 = 300
    x2 = jax.random.normal(jax.random.PRNGKey(1), (batch2, IN_F), jnp.float32)
    out2 = jax.block_until_ready(simple_model_forward(x2, *params, block_b=128))
    ref2 = _reference(x2, w1, b1, w2, b2)
    assert out2.shape == (batch2, 1), out2.shape
    assert jnp.allclose(out2, ref2, atol=1e-5, rtol=1e-5)

    print("KERNEL_OK")
</pallas_src>

<mosaic_0001>
module attributes {stable_mosaic.version = 11 : i64} {
  func.func @mlp_kernel(%arg0: i32, %arg1: memref<128x10xf32, #tpu.memory_space<vmem>>, %arg2: memref<10x128xf32, #tpu.memory_space<vmem>>, %arg3: memref<1x128xf32, #tpu.memory_space<vmem>>, %arg4: memref<1x128xf32, #tpu.memory_space<vmem>>, %arg5: memref<1x1xf32, #tpu.memory_space<vmem>>, %arg6: memref<1x128xf32, #tpu.memory_space<vmem>>) attributes {dimension_semantics = [#tpu.dimension_semantics<parallel>], iteration_bounds = array<i64: 1>, scalar_prefetch = 0 : i64, scratch_operands = 0 : i64, tpu.core_type = #tpu.core_type<tc>, window_params = [{transform_indices = @transform_0, window_bounds = array<i64: 128, 10>}, {pipeline_mode = #tpu.pipeline_mode<synchronous>, transform_indices = @transform_1, window_bounds = array<i64: 10, 128>}, {pipeline_mode = #tpu.pipeline_mode<synchronous>, transform_indices = @transform_2, window_bounds = array<i64: 1, 128>}, {pipeline_mode = #tpu.pipeline_mode<synchronous>, transform_indices = @transform_3, window_bounds = array<i64: 1, 128>}, {pipeline_mode = #tpu.pipeline_mode<synchronous>, transform_indices = @transform_4, window_bounds = array<i64: 1, 1>}, {transform_indices = @transform_5, window_bounds = array<i64: 1, 128>}]} {
    %c0 = arith.constant 0 : index
    %c0_0 = arith.constant 0 : index
    %0 = vector.load %arg1[%c0, %c0_0] : memref<128x10xf32, #tpu.memory_space<vmem>>, vector<128x10xf32>
    %c0_1 = arith.constant 0 : index
    %c0_2 = arith.constant 0 : index
    %1 = vector.load %arg2[%c0_1, %c0_2] : memref<10x128xf32, #tpu.memory_space<vmem>>, vector<10x128xf32>
    %cst = arith.constant dense<0.000000e+00> : vector<128x128xf32>
    %2 = tpu.matmul %0, %1, %cst {dimension_numbers = #tpu.dot_dimension_numbers<[1], [0], [0], [1], [0, 0, 1, 1], [], []>} : vector<128x10xf32>, vector<10x128xf32>, vector<128x128xf32> -> vector<128x128xf32>
    %c0_3 = arith.constant 0 : index
    %c0_4 = arith.constant 0 : index
    %3 = vector.load %arg3[%c0_3, %c0_4] : memref<1x128xf32, #tpu.memory_space<vmem>>, vector<1x128xf32>
    %4 = vector.broadcast %3 : vector<1x128xf32> to vector<128x128xf32>
    %5 = arith.addf %2, %4 : vector<128x128xf32>
    %cst_5 = arith.constant 0.000000e+00 : f32
    %6 = vector.broadcast %cst_5 : f32 to vector<128x128xf32>
    %7 = arith.maximumf %5, %6 : vector<128x128xf32>
    %c0_6 = arith.constant 0 : index
    %c0_7 = arith.constant 0 : index
    %8 = vector.load %arg4[%c0_6, %c0_7] : memref<1x128xf32, #tpu.memory_space<vmem>>, vector<1x128xf32>
    %9 = vector.broadcast %8 : vector<1x128xf32> to vector<128x128xf32>
    %10 = arith.mulf %7, %9 : vector<128x128xf32>
    %cst_8 = arith.constant dense<0.000000e+00> : vector<128xf32>
    %11 = vector.multi_reduction <add>, %10, %cst_8 [1] : vector<128x128xf32> to vector<128xf32>
    %12 = vector.shape_cast %11 : vector<128xf32> to vector<1x128xf32>
    %c0_9 = arith.constant 0 : index
    %c0_10 = arith.constant 0 : index
    %13 = vector.load %arg5[%c0_9, %c0_10] : memref<1x1xf32, #tpu.memory_space<vmem>>, vector<1x1xf32>
    %14 = vector.broadcast %13 : vector<1x1xf32> to vector<1x128xf32>
    %15 = arith.addf %12, %14 : vector<1x128xf32>
    %c0_11 = arith.constant 0 : index
    %c0_12 = arith.constant 0 : index
    %16 = vector.load %arg6[%c0_11, %c0_12] : memref<1x128xf32, #tpu.memory_space<vmem>>, vector<1x128xf32>
    tpu.vector_store %arg6[%c0_11, %c0_12], %15 {strides = array<i32>} : memref<1x128xf32, #tpu.memory_space<vmem>>, vector<1x128xf32>,
    return
  }
  func.func @transform_0(%arg0: i32) -> (i32, i32) {
    %c0_i32 = arith.constant 0 : i32
    %c0_i32_0 = arith.constant 0 : i32
    return %arg0, %c0_i32 : i32, i32
  }
  func.func @transform_1(%arg0: i32) -> (i32, i32) {
    %c0_i32 = arith.constant 0 : i32
    %c0_i32_0 = arith.constant 0 : i32
    %c0_i32_1 = arith.constant 0 : i32
    return %c0_i32, %c0_i32_0 : i32, i32
  }
  func.func @transform_2(%arg0: i32) -> (i32, i32) {
    %c0_i32 = arith.constant 0 : i32
    %c0_i32_0 = arith.constant 0 : i32
    %c0_i32_1 = arith.constant 0 : i32
    return %c0_i32, %c0_i32_0 : i32, i32
  }
  func.func @transform_3(%arg0: i32) -> (i32, i32) {
    %c0_i32 = arith.constant 0 : i32
    %c0_i32_0 = arith.constant 0 : i32
    %c0_i32_1 = arith.constant 0 : i32
    return %c0_i32, %c0_i32_0 : i32, i32
  }
  func.func @transform_4(%arg0: i32) -> (i32, i32) {
    %c0_i32 = arith.constant 0 : i32
    %c0_i32_0 = arith.constant 0 : i32
    %c0_i32_1 = arith.constant 0 : i32
    return %c0_i32, %c0_i32_0 : i32, i32
  }
  func.func @transform_5(%arg0: i32) -> (i32, i32) {
    %c0_i32 = arith.constant 0 : i32
    %c0_i32_0 = arith.constant 0 : i32
    return %c0_i32, %arg0 : i32, i32
  }
}

</mosaic_0001>

<bundles_post_ra>
// kernel: simple_model_forward.1
= control target key start
LH: loop header
LB: loop body
LE: loop exit
PB: predicated region body
PF: predicated region fallthrough
CT: control target
= control target key end

     0   :  { %vm96_vm0 = vcmask 1041408   ;;  %vm47_vm1 = vcmask 80896   ;;  %vm552_vm2 = vmmov 1   ;;  %v553_v20 = vmov 0   ;;  %s766_s1 = inlined_call_operand.vmem [shape: f32[10,128], index: 1, kind: input, shape index: {}]   ;;  %s767_s0 = inlined_call_operand.vmem [shape: f32[128,10], index: 0, kind: input, shape index: {}]   ;;  %s768_s4 = inlined_call_operand.<no memory space> [shape: f32[1,1], index: 4, kind: input, shape index: {}]   ;;  %s769_s2 = inlined_call_operand.vmem [shape: f32[1,128], index: 2, kind: input, shape index: {}]   ;;  %s770_s3 = inlined_call_operand.vmem [shape: f32[1,128], index: 3, kind: input, shape index: {}]   ;;  %s771_s5 = inlined_call_operand.vmem [shape: f32[1,128], index: 5, kind: output, shape index: {}]  }
   0x1   :  { %v38_v0 = vld [vmem:[%s766_s1] sm:$0xff]  ;;  %v39_v1 = vld [vmem:[%s766_s1 + $0x8] sm:$0x3]  ;;  %vm541_vm3 = vmpackc.low %vm96_vm0, %vm552_vm2  ;;  %v10_v19 = vstv %s768_s4  ;;  %550 = vset.pattern.permute.xlu1 %v553_v20  ;;  %551 = vset.pattern.permute.xlu0 %v553_v20  ;;  %vm369_vm4 = vcmask 130112   ;;  %vm376_vm5 = vcmask 195712   ;;  %vm383_vm6 = vcmask 261312  }
   0x2   :  { %v540_v2 = vpack.c.bf16 %v39_v1, %v38_v0  ;;  %v22_v3 = vld [vmem:[%s767_s0] sm:$0xff]  ;;  %v23_v5 = vld [vmem:[%s767_s0 + $0x8] sm:$0xff]  ;;  %v24_v7 = vld [vmem:[%s767_s0 + $0x10] sm:$0xff]  ;;  %11 = vst [vmem:[#allocation2] sm:$0x1] %v10_v19  ;;  %vm390_vm7 = vcmask 326912  }
   0x3   :  { %516 = vmatprep.mubr.msk.f32.mxu0 %vm47_vm1, %v22_v3  ;;  %v30_v4 = vld [vmem:[%s767_s0 + $0x40] sm:$0xff]  ;;  %v31_v6 = vld [vmem:[%s767_s0 + $0x48] sm:$0xff]  ;;  %v32_v8 = vld [vmem:[%s767_s0 + $0x50] sm:$0xff]  ;;  %vm397_vm8 = vcmask 392512   ;;  %vm404_vm9 = vcmask 458112   ;;  %vm411_vm10 = vcmask 523712  }
   0x4   :  { %542 = vmatprep.subr.msk.bf16.mxu0 %vm541_vm3, %v540_v2  ;;  %546 = vmatprep.subr.msk.bf16.mxu1 %vm541_vm3, %v540_v2  ;;  %v25_v9 = vld [vmem:[%s767_s0 + $0x18] sm:$0xff]  ;;  %v26_v11 = vld [vmem:[%s767_s0 + $0x20] sm:$0xff]  ;;  %v27_v13 = vld [vmem:[%s767_s0 + $0x28] sm:$0xff]  ;;  %vm418_vm11 = vcmask 589312   ;;  %vm425_vm12 = vcmask 654912   ;;  %vm432_vm13 = vcmask 720512  }
   0x5   :  { %545 = vmatpush3.bf16.msk.msra.mxu0 %vm541_vm3, %v540_v2  ;;  %547 = vmatpush3.bf16.msk.msra.mxu1 %vm541_vm3, %v540_v2  ;;  %v33_v10 = vld [vmem:[%s767_s0 + $0x58] sm:$0xff]  ;;  %v34_v12 = vld [vmem:[%s767_s0 + $0x60] sm:$0xff]  ;;  %v35_v14 = vld [vmem:[%s767_s0 + $0x68] sm:$0xff]  ;;  %vm439_vm14 = vcmask 786112   ;;  %vm446_vm15 = vcmask 851712   ;;  %vm453_vm0 = vcmask 917312  }
   0x6   :  { %528 = vmatprep.mubr.msk.f32.mxu1 %vm47_vm1, %v30_v4  ;;  %v28_v15 = vld [vmem:[%s767_s0 + $0x30] sm:$0xff]  ;;  %v29_v17 = vld [vmem:[%s767_s0 + $0x38] sm:$0xff]  ;;  %v660_v21 = vld [vmem:[%s769_s2] ss:$0 sm:$0xff]  ;;  %vm467_vm2 = vcmask 1048512  }
   0x7   :  { %v36_v16 = vld [vmem:[%s767_s0 + $0x70] sm:$0xff]  ;;  %v37_v18 = vld [vmem:[%s767_s0 + $0x78] sm:$0xff]  ;;  %v667_v28 = vld [vmem:[%s770_s3] ss:$0 sm:$0xff] }
   0x8   :  { %517 = vmatmul.mubr.msk.f32.vlgmr.msra.gmra.mrb[0].mxu0 %vm47_vm1, %v23_v5  ;;  %529 = vmatmul.mubr.msk.f32.vlgmr.msra.gmra.mrb[0].mxu1 %vm47_vm1, %v31_v6 }
   0x9   :  { %519 = vmatprep.mubr.msk.f32.mxu0 %vm47_vm1, %v24_v7  ;;  %531 = vmatprep.mubr.msk.f32.mxu1 %vm47_vm1, %v32_v8 }
   0xc   :  { %520 = vmatmul.mubr.msk.f32.gmra.mrb[2].mxu0 %vm47_vm1, %v25_v9  ;;  %532 = vmatmul.mubr.msk.f32.gmra.mrb[2].mxu1 %vm47_vm1, %v33_v10 }
   0xd   :  { %522 = vmatprep.mubr.msk.f32.mxu0 %vm47_vm1, %v26_v11  ;;  %534 = vmatprep.mubr.msk.f32.mxu1 %vm47_vm1, %v34_v12 }
  0x10   :  { %523 = vmatmul.mubr.msk.f32.gmra.mrb[4].mxu0 %vm47_vm1, %v27_v13  ;;  %535 = vmatmul.mubr.msk.f32.gmra.mrb[4].mxu1 %vm47_vm1, %v35_v14  ;;  %v316_v14 = vld [vmem:[#allocation2] sm:$0x1] }
  0x11   :  { %525 = vmatprep.mubr.msk.f32.mxu0 %vm47_vm1, %v28_v15  ;;  %537 = vmatprep.mubr.msk.f32.mxu1 %vm47_vm1, %v36_v16 }
  0x14   :  { %526 = vmatmul.mubr.msk.f32.gmra.mrb[6].mxu0 %vm47_vm1, %v29_v17  ;;  %538 = vmatmul.mubr.msk.f32.gmra.mrb[6].mxu1 %vm47_vm1, %v37_v18  ;;  %vm460_vm1 = vcmask 982912  }
  0xdb   :  { %v518_v22 = vpop.f32.mrb[0].mxu0  ;;  %v530_v23 = vpop.f32.mrb[0].mxu1 }
  0xdc   :  { %v172_v24 = vadd.f32 %v518_v22, %v660_v21  ;;  %v166_v25 = vpop.f32.mrb[1].mxu0  ;;  %v206_v26 = vpop.f32.mrb[1].mxu1  ;;  %v212_v41 = vadd.f32 %v530_v23, %v660_v21 }
  0xdd   :  { %v167_v27 = vadd.f32 %v660_v21, %v166_v25  ;;  %v207_v30 = vadd.f32 %v660_v21, %v206_v26 }
  0xde   :  { %v246_v29 = vmax.f32 %v172_v24, 0.0  ;;  %v254_v53 = vmax.f32 %v212_v41, 0.0 }
  0xdf   :  { %v245_v31 = vmax.f32 %v167_v27, 0.0  ;;  %v521_v32 = vpop.f32.mrb[2].mxu0  ;;  %v533_v33 = vpop.f32.mrb[2].mxu1  ;;  %v253_v42 = vmax.f32 %v207_v30, 0.0 }
  0xe0   :  { %v182_v34 = vadd.f32 %v521_v32, %v660_v21  ;;  %v176_v35 = vpop.f32.mrb[3].mxu0  ;;  %v269_v36 = vmul.f32 %v667_v28, %v246_v29  ;;  %v222_v37 = vadd.f32 %v533_v33, %v660_v21  ;;  %v216_v38 = vpop.f32.mrb[3].mxu1  ;;  %v277_v0 = vmul.f32 %v667_v28, %v254_v53 }
  0xe1   :  { %v177_v39 = vadd.f32 %v660_v21, %v176_v35  ;;  %v268_v45 = vmul.f32 %v667_v28, %v245_v31  ;;  %v276_v55 = vmul.f32 %v667_v28, %v253_v42  ;;  %v217_v56 = vadd.f32 %v660_v21, %v216_v38 }
  0xe2   :  { %v248_v40 = vmax.f32 %v182_v34, 0.0  ;;  %286 = vadd.xlane.f32.xlu0 %v269_v36  ;;  %v256_v43 = vmax.f32 %v222_v37, 0.0  ;;  %v322_v31 = vlaneseq }
  0xe3   :  { %v524_v44 = vpop.f32.mrb[4].mxu0  ;;  %v536_v46 = vpop.f32.mrb[4].mxu1  ;;  %v247_v47 = vmax.f32 %v177_v39, 0.0  ;;  %v255_v62 = vmax.f32 %v217_v56, 0.0 }
  0xe4   :  { %v271_v48 = vmul.f32 %v667_v28, %v248_v40  ;;  %v192_v49 = vadd.f32 %v524_v44, %v660_v21  ;;  %v186_v50 = vpop.f32.mrb[5].mxu0  ;;  %v226_v51 = vpop.f32.mrb[5].mxu1  ;;  %v279_v52 = vmul.f32 %v667_v28, %v256_v43  ;;  %v232_v11 = vadd.f32 %v536_v46, %v660_v21 }
  0xe5   :  { %v270_v59 = vmul.f32 %v667_v28, %v247_v47  ;;  %v187_v1 = vadd.f32 %v660_v21, %v186_v50  ;;  %v278_v2 = vmul.f32 %v667_v28, %v255_v62  ;;  %v227_v3 = vadd.f32 %v660_v21, %v226_v51 }
  0xe6   :  { %290 = vadd.xlane.f32.xlu1 %v271_v48  ;;  %v250_v54 = vmax.f32 %v192_v49, 0.0  ;;  %284 = vadd.xlane.f32.xlu0 %v268_v45  ;;  %v258_v15 = vmax.f32 %v232_v11, 0.0  ;;  %v703_v34 = vshrl.u32 %v322_v31, 7  ;;  %v706_v36 = vand.u32 127, %v322_v31 }
  0xe7   :  { %v527_v57 = vpop.f32.mrb[6].mxu0  ;;  %v539_v58 = vpop.f32.mrb[6].mxu1  ;;  %v249_v4 = vmax.f32 %v187_v1, 0.0  ;;  %v257_v5 = vmax.f32 %v227_v3, 0.0 }
  0xe8   :  { %v196_v60 = vpop.f32.mrb[7].mxu0  ;;  %v236_v61 = vpop.f32.mrb[7].mxu1  ;;  %v273_v63 = vmul.f32 %v667_v28, %v250_v54  ;;  %v202_v6 = vadd.f32 %v527_v57, %v660_v21  ;;  %v242_v18 = vadd.f32 %v539_v58, %v660_v21  ;;  %v281_v20 = vmul.f32 %v667_v28, %v258_v15 }
  0xe9   :  { %v272_v7 = vmul.f32 %v667_v28, %v249_v4  ;;  %v280_v9 = vmul.f32 %v667_v28, %v257_v5  ;;  %v197_v10 = vadd.f32 %v660_v21, %v196_v60  ;;  %v237_v17 = vadd.f32 %v660_v21, %v236_v61 }
  0xea   :  { %288 = vadd.xlane.f32.xlu1 %v270_v59  ;;  %300 = vadd.xlane.f32.xlu0 %v276_v55  ;;  %v252_v8 = vmax.f32 %v202_v6, 0.0  ;;  %v260_v22 = vmax.f32 %v242_v18, 0.0  ;;  %v324_v35 = vsub.s32 0, %v703_v34  ;;  %v364_v39 = vadd.s32 4294967288, %v706_v36 }
  0xeb   :  { %v251_v12 = vmax.f32 %v197_v10, 0.0  ;;  %v259_v19 = vmax.f32 %v237_v17, 0.0  ;;  %v371_v41 = vadd.s32 4294967280, %v706_v36  ;;  %v362_v44 = vsub.s32 %v706_v36, %v703_v34 }
  0xec   :  { %v275_v13 = vmul.f32 %v667_v28, %v252_v8  ;;  %v283_v24 = vmul.f32 %v667_v28, %v260_v22  ;;  %v367_v45 = vsub.s32 %v364_v39, %v703_v34  ;;  %v378_v50 = vadd.s32 4294967272, %v706_v36 }
  0xed   :  { %v274_v16 = vmul.f32 %v667_v28, %v251_v12  ;;  %v282_v23 = vmul.f32 %v667_v28, %v259_v19  ;;  %v374_v47 = vsub.s32 %v371_v41, %v703_v34  ;;  %v392_v59 = vadd.s32 4294967256, %v706_v36 }
  0xee   :  { %294 = vadd.xlane.f32.xlu1 %v273_v63  ;;  %302 = vadd.xlane.f32.xlu0 %v277_v0  ;;  %v381_v56 = vsub.s32 %v378_v50, %v703_v34  ;;  %v399_v60 = vadd.s32 4294967248, %v706_v36  ;;  %v406_v5 = vadd.s32 4294967240, %v706_v36  ;;  %v413_v8 = vadd.s32 4294967232, %v706_v36 }
  0xef   :  { %v395_v1 = vsub.s32 %v392_v59, %v703_v34  ;;  %v427_v19 = vadd.s32 4294967216, %v706_v36 }
  0xf0   :  { %v409_v11 = vsub.s32 %v406_v5, %v703_v34  ;;  %v416_v17 = vsub.s32 %v413_v8, %v703_v34 }
  0xf1   :  { %v430_v31 = vsub.s32 %v427_v19, %v703_v34 }
  0xf2   :  { %304 = vadd.xlane.f32.xlu0 %v278_v2  ;;  %v402_v2 = vsub.s32 %v399_v60, %v703_v34 }
  0xf6   :  { %292 = vadd.xlane.f32.xlu0 %v272_v7 }
  0xfa   :  { %308 = vadd.xlane.f32.xlu0 %v280_v9 }
  0xfe   :  { %298 = vadd.xlane.f32.xlu0 %v275_v13 }
  0xff   :  { %319 = vperm.xlu1 %550, %v316_v14   ;;  %v420_v14 = vadd.s32 4294967224, %v706_v36 }
 0x102   :  { %296 = vadd.xlane.f32.xlu0 %v274_v16 }
 0x106   :  { %310 = vadd.xlane.f32.xlu0 %v281_v20 }
 0x10a   :  { %312 = vadd.xlane.f32.xlu0 %v282_v23  ;;  %v423_v23 = vsub.s32 %v420_v14, %v703_v34 }
 0x10e   :  { %314 = vadd.xlane.f32.xlu0 %v283_v24 }
 0x123   :  { %306 = vadd.xlane.f32.xlu1 %v279_v52  ;;  %v385_v52 = vadd.s32 4294967264, %v706_v36 }
 0x125   :  { %v388_v57 = vsub.s32 %v385_v52, %v703_v34 }
 0x16f   :  { %v287_v25 = vpop.xlane.xlu0 %286 }
 0x173   :  { %v285_v26 = vpop.xlane.xlu0 %284  ;;  %v291_v29 = vpop.xlane.xlu1 %290 }
 0x177   :  { %v301_v27 = vpop.xlane.xlu0 %300  ;;  %v289_v21 = vpop.xlane.xlu1 %288 }
 0x17b   :  { %v699_v30 = vpop.xlane.xlu0 %302  ;;  %v295_v33 = vpop.xlane.xlu1 %294 }
 0x17f   :  { %v701_v32 = vpop.xlane.xlu0 %304  ;;  %v320_v37 = vpop.permute.xlu1 %319 }
 0x180   :  { %v708_v38 = vrot.slane %v320_v37, %v324_v35  ;;  %v462_v37 = vadd.s32 4294967176, %v706_v36 }
 0x182   :  { %v326_v42 = vadd.f32 %v708_v38, %v285_v26  ;;  %v327_v43 = vadd.f32 %v708_v38, %v287_v25  ;;  %v328_v46 = vadd.f32 %v708_v38, %v289_v21  ;;  %v329_v54 = vadd.f32 %v708_v38, %v291_v29 }
 0x183   :  { %v293_v28 = vpop.xlane.xlu0 %292  ;;  %v331_v6 = vadd.f32 %v708_v38, %v295_v33  ;;  %v334_v16 = vadd.f32 %v708_v38, %v301_v27  ;;  %v434_v25 = vadd.s32 4294967208, %v706_v36  ;;  %v335_v26 = vadd.f32 %v708_v38, %v699_v30 }
 0x184   :  { %v363_v48 = vrot.slane %v326_v42, %v362_v44  ;;  %v368_v49 = vrot.slane %v327_v43, %v367_v45  ;;  %v375_v53 = vrot.slane %v328_v46, %v374_v47  ;;  %v330_v58 = vadd.f32 %v708_v38, %v293_v28 }
 0x185   :  { %v382_v63 = vrot.slane %v329_v54, %v381_v56  ;;  %v396_v13 = vrot.slane %v331_v6, %v395_v1  ;;  %v441_v29 = vadd.s32 4294967200, %v706_v36  ;;  %v417_v27 = vrot.slane %v334_v16, %v416_v17 }
 0x186   :  { %v370_v55 = vsel %vm369_vm4, %v368_v49, %v363_v48  ;;  %v389_v0 = vrot.slane %v330_v58, %v388_v57  ;;  %v448_v21 = vadd.s32 4294967192, %v706_v36  ;;  %v336_v33 = vadd.f32 %v708_v38, %v701_v32 }
 0x187   :  { %v711_v40 = vpop.xlane.xlu0 %308  ;;  %v377_v62 = vsel %vm376_vm5, %v375_v53, %v370_v55  ;;  %v455_v28 = vadd.s32 4294967184, %v706_v36  ;;  %v437_v39 = vsub.s32 %v434_v25, %v703_v34  ;;  %v424_v41 = vrot.slane %v335_v26, %v423_v23 }
 0x188   :  { %v384_v4 = vsel %vm383_vm6, %v382_v63, %v377_v62  ;;  %v444_v30 = vsub.s32 %v441_v29, %v703_v34  ;;  %v338_v42 = vadd.f32 %v708_v38, %v711_v40  ;;  %v451_v43 = vsub.s32 %v448_v21, %v703_v34 }
 0x189   :  { %v391_v7 = vsel %vm390_vm7, %v389_v0, %v384_v4  ;;  %v431_v48 = vrot.slane %v336_v33, %v430_v31  ;;  %v458_v36 = vsub.s32 %v455_v28, %v703_v34  ;;  %v465_v50 = vsub.s32 %v462_v37, %v703_v34 }
 0x18a   :  { %v398_v15 = vsel %vm397_vm8, %v396_v13, %v391_v7  ;;  %v445_v52 = vrot.slane %v338_v42, %v444_v30 }
 0x18b   :  { %v299_v51 = vpop.xlane.xlu0 %298 }
 0x18c   :  { %v333_v12 = vadd.f32 %v708_v38, %v299_v51 }
 0x18e   :  { %v410_v20 = vrot.slane %v333_v12, %v409_v11 }
 0x18f   :  { %v297_v61 = vpop.xlane.xlu0 %296 }
 0x190   :  { %v332_v3 = vadd.f32 %v708_v38, %v297_v61 }
 0x192   :  { %v403_v9 = vrot.slane %v332_v3, %v402_v2 }
 0x193   :  { %v311_v10 = vpop.xlane.xlu0 %310 }
 0x194   :  { %v405_v18 = vsel %vm404_vm9, %v403_v9, %v398_v15  ;;  %v339_v32 = vadd.f32 %v708_v38, %v311_v10 }
 0x195   :  { %v412_v24 = vsel %vm411_vm10, %v410_v20, %v405_v18 }
 0x196   :  { %v419_v35 = vsel %vm418_vm11, %v417_v27, %v412_v24  ;;  %v452_v54 = vrot.slane %v339_v32, %v451_v43 }
 0x197   :  { %v313_v22 = vpop.xlane.xlu0 %312  ;;  %v426_v47 = vsel %vm425_vm12, %v424_v41, %v419_v35 }
 0x198   :  { %v340_v49 = vadd.f32 %v708_v38, %v313_v22  ;;  %v433_v53 = vsel %vm432_vm13, %v431_v48, %v426_v47 }
 0x19a   :  { %v459_v56 = vrot.slane %v340_v49, %v458_v36 }
 0x19b   :  { %v315_v44 = vpop.xlane.xlu0 %314 }
 0x19c   :  { %v341_v40 = vadd.f32 %v708_v38, %v315_v44 }
 0x19e   :  { %v466_v58 = vrot.slane %v341_v40, %v465_v50 }
 0x1b0   :  { %v307_v45 = vpop.xlane.xlu1 %306 }
 0x1b1   :  { %v337_v46 = vadd.f32 %v708_v38, %v307_v45 }
 0x1b3   :  { %v438_v51 = vrot.slane %v337_v46, %v437_v39 }
 0x1b5   :  { %v440_v55 = vsel %vm439_vm14, %v438_v51, %v433_v53 }
 0x1b6   :  { %v447_v57 = vsel %vm446_vm15, %v445_v52, %v440_v55 }
 0x1b7   :  { %v454_v59 = vsel %vm453_vm0, %v452_v54, %v447_v57 }
 0x1b8   :  { %v461_v60 = vsel %vm460_vm1, %v459_v56, %v454_v59 }
 0x1b9   :  { %v468_v61 = vsel %vm467_vm2, %v466_v58, %v461_v60 }
 0x1ba   :  { %470 = vst [vmem:[%s771_s5] sm:$0x1] %v468_v61 }

</bundles_post_ra>
